<compile_context>
chip_gen: v7x
topology: tpu7x:2x2x1
jax: 0.10.0
libtpu: 0.0.40
codegen_flags: <defaults>
</compile_context>

<pallas_src>
import jax
import jax.numpy as jnp
from jax.experimental import pallas as pl
from jax.experimental.pallas import tpu as pltpu

EPS = 1e-5  # RevIN default eps


def _linear_kernel(x_ref, w_ref, b_ref, o_ref):
    # x_ref: (L, TN)   lane axis = flattened (batch * feature) columns
    # w_ref: (P, L)    folded weight  W2 @ W1   (resident across grid steps)
    # b_ref: (P, 1)    folded bias    W2 @ b1 + b2
    # o_ref: (P, TN)
    x = x_ref[...].astype(jnp.float32)

    # --- RevIN 'norm': stats over the time axis (sublanes), per column ---
    mean = jnp.mean(x, axis=0, keepdims=True)          # (1, TN)
    xc = x - mean                                       # reused for var & xn
    var = jnp.mean(xc * xc, axis=0, keepdims=True)      # (1, TN)
    rstd = jax.lax.rsqrt(var + EPS)                     # EUP slot
    xn = xc * rstd                                      # (L, TN)

    # --- folded time-axis linear: (P, L) @ (L, TN) -> (P, TN) on the MXU ---
    y = jnp.dot(w_ref[...], xn, preferred_element_type=jnp.float32)
    y = y + b_ref[...]                                  # lane-broadcast bias add

    # --- RevIN 'denorm' ---
    stdev = jnp.sqrt(var + EPS)
    o_ref[...] = (y * stdev + mean).astype(o_ref.dtype)


def linear_forward(x, x_mark, params):
    """x: (B, L, D) float32.  x_mark is accepted but unused (as in PyTorch)."""
    del x_mark
    B, L, D = x.shape
    w1, b1, w2, b2 = params["w1"], params["b1"], params["w2"], params["b2"]
    M, P = w1.shape[0], w2.shape[0]
    assert w1.shape == (M, L) and w2.shape == (P, M)

    # Fold the two linears once (pure composition, no nonlinearity between).
    w = (w2 @ w1).astype(jnp.float32)                   # (P, L)
    b = (w2 @ b1 + b2).reshape(P, 1).astype(jnp.float32)

    # Lane-dense activation slab: columns = flattened (batch, feature).
    N = B * D
    xp = jnp.transpose(x, (1, 0, 2)).reshape(L, N)      # (L, B*D)

    # Lane tile: lane-aligned multiples of 128 when possible, else full width
    # (block_shape equal to the full array dim is always legal).
    if N % 512 == 0:
        tn = 512
    elif N % 256 == 0:
        tn = 256
    elif N % 128 == 0:
        tn = 128
    else:
        tn = N
    grid = (pl.cdiv(N, tn),)

    out = pl.pallas_call(
        _linear_kernel,
        out_shape=jax.ShapeDtypeStruct((P, N), jnp.float32),
        grid_spec=pltpu.PrefetchScalarGridSpec(
            num_scalar_prefetch=0,
            grid=grid,
            in_specs=[
                pl.BlockSpec((L, tn), lambda n: (0, n)),   # activation tile
                pl.BlockSpec((P, L), lambda n: (0, 0)),    # folded weight
                pl.BlockSpec((P, 1), lambda n: (0, 0)),    # folded bias
            ],
            out_specs=pl.BlockSpec((P, tn), lambda n: (0, n)),
        ),
        compiler_params=pltpu.CompilerParams(
            dimension_semantics=("parallel",)),            # megacore on v7x
    )(xp, w, b)

    # (P, B*D) -> (B, P, D)
    return jnp.transpose(out.reshape(P, B, D), (1, 0, 2))


def init_params(key, seq_len, pred_len):
    """Deterministic nn.Linear-style init (uniform +- 1/sqrt(fan_in))."""
    M = seq_len + pred_len
    k1, k2, k3, k4 = jax.random.split(key, 4)
    lim1 = 1.0 / jnp.sqrt(seq_len)
    lim2 = 1.0 / jnp.sqrt(M)
    return {
        "w1": jax.random.uniform(k1, (M, seq_len), jnp.float32, -lim1, lim1),
        "b1": jax.random.uniform(k2, (M,), jnp.float32, -lim1, lim1),
        "w2": jax.random.uniform(k3, (pred_len, M), jnp.float32, -lim2, lim2),
        "b2": jax.random.uniform(k4, (pred_len,), jnp.float32, -lim2, lim2),
    }


def reference_forward(x, params):
    """Pure-JAX reference mirroring the PyTorch forward (revin=True)."""
    mean = jnp.mean(x, axis=1, keepdims=True)
    var = jnp.mean((x - mean) ** 2, axis=1, keepdims=True)
    stdev = jnp.sqrt(var + EPS)
    xn = (x - mean) / stdev
    xt = jnp.transpose(xn, (0, 2, 1))                    # B D L
    y = xt @ params["w1"].T + params["b1"]               # B D M
    y = y @ params["w2"].T + params["b2"]                # B D P
    y = jnp.transpose(y, (0, 2, 1))                      # B P D
    return y * stdev + mean


if __name__ == "__main__":
    # config: enc_in=4, seq_len=16, pred_len=8, revin=True
    # (d_model / input_size / rank only feed the unused feature linears.)
    B, L, D, P = 2, 16, 4, 8

    key = jax.random.PRNGKey(0)
    kx, km, kp = jax.random.split(key, 3)
    x = jax.random.normal(kx, (B, L, D), dtype=jnp.float32)
    x_mark = jax.random.normal(km, (B, L, D), dtype=jnp.float32)  # unused
    params = init_params(kp, L, P)

    out = linear_forward(x, x_mark, params)
    out = jax.block_until_ready(out)

    ref = reference_forward(x, params)
    assert out.shape == (B, P, D)
    assert jnp.allclose(out, ref, atol=1e-4, rtol=1e-4)

    print("KERNEL_OK")
</pallas_src>

<mosaic_0001>
module attributes {stable_mosaic.version = 11 : i64} {
  func.func @_linear_kernel(%arg0: i32, %arg1: memref<16x8xf32, #tpu.memory_space<vmem>>, %arg2: memref<8x16xf32, #tpu.memory_space<vmem>>, %arg3: memref<8x1xf32, #tpu.memory_space<vmem>>, %arg4: memref<8x8xf32, #tpu.memory_space<vmem>>) attributes {dimension_semantics = [#tpu.dimension_semantics<parallel>], iteration_bounds = array<i64: 1>, scalar_prefetch = 0 : i64, scratch_operands = 0 : i64, tpu.core_type = #tpu.core_type<tc>, window_params = [{transform_indices = @transform_0, window_bounds = array<i64: 16, 8>}, {pipeline_mode = #tpu.pipeline_mode<synchronous>, transform_indices = @transform_1, window_bounds = array<i64: 8, 16>}, {pipeline_mode = #tpu.pipeline_mode<synchronous>, transform_indices = @transform_2, window_bounds = array<i64: 8, 1>}, {transform_indices = @transform_3, window_bounds = array<i64: 8, 8>}]} {
    %c0 = arith.constant 0 : index
    %c0_0 = arith.constant 0 : index
    %0 = vector.load %arg1[%c0, %c0_0] : memref<16x8xf32, #tpu.memory_space<vmem>>, vector<16x8xf32>
    %cst = arith.constant dense<0.000000e+00> : vector<8xf32>
    %1 = vector.multi_reduction <add>, %0, %cst [0] : vector<16x8xf32> to vector<8xf32>
    %2 = vector.shape_cast %1 : vector<8xf32> to vector<1x8xf32>
    %cst_1 = arith.constant 1.600000e+01 : f32
    %3 = vector.broadcast %cst_1 : f32 to vector<1x8xf32>
    %4 = arith.divf %2, %3 : vector<1x8xf32>
    %5 = vector.broadcast %4 : vector<1x8xf32> to vector<16x8xf32>
    %6 = arith.subf %0, %5 : vector<16x8xf32>
    %7 = arith.mulf %6, %6 : vector<16x8xf32>
    %cst_2 = arith.constant dense<0.000000e+00> : vector<8xf32>
    %8 = vector.multi_reduction <add>, %7, %cst_2 [0] : vector<16x8xf32> to vector<8xf32>
    %9 = vector.shape_cast %8 : vector<8xf32> to vector<1x8xf32>
    %cst_3 = arith.constant 1.600000e+01 : f32
    %10 = vector.broadcast %cst_3 : f32 to vector<1x8xf32>
    %11 = arith.divf %9, %10 : vector<1x8xf32>
    %cst_4 = arith.constant 9.99999974E-6 : f32
    %12 = vector.broadcast %cst_4 : f32 to vector<1x8xf32>
    %13 = arith.addf %11, %12 : vector<1x8xf32>
    %14 = math.rsqrt %13 : vector<1x8xf32>
    %15 = vector.broadcast %14 : vector<1x8xf32> to vector<16x8xf32>
    %16 = arith.mulf %6, %15 : vector<16x8xf32>
    %c0_5 = arith.constant 0 : index
    %c0_6 = arith.constant 0 : index
    %17 = vector.load %arg2[%c0_5, %c0_6] : memref<8x16xf32, #tpu.memory_space<vmem>>, vector<8x16xf32>
    %cst_7 = arith.constant dense<0.000000e+00> : vector<8x8xf32>
    %18 = tpu.matmul %17, %16, %cst_7 {dimension_numbers = #tpu.dot_dimension_numbers<[1], [0], [0], [1], [0, 0, 1, 1], [], []>} : vector<8x16xf32>, vector<16x8xf32>, vector<8x8xf32> -> vector<8x8xf32>
    %c0_8 = arith.constant 0 : index
    %c0_9 = arith.constant 0 : index
    %19 = vector.load %arg3[%c0_8, %c0_9] : memref<8x1xf32, #tpu.memory_space<vmem>>, vector<8x1xf32>
    %20 = vector.broadcast %19 : vector<8x1xf32> to vector<8x8xf32>
    %21 = arith.addf %18, %20 : vector<8x8xf32>
    %cst_10 = arith.constant 9.99999974E-6 : f32
    %22 = vector.broadcast %cst_10 : f32 to vector<1x8xf32>
    %23 = arith.addf %11, %22 : vector<1x8xf32>
    %24 = math.sqrt %23 : vector<1x8xf32>
    %25 = vector.broadcast %24 : vector<1x8xf32> to vector<8x8xf32>
    %26 = arith.mulf %21, %25 : vector<8x8xf32>
    %27 = vector.broadcast %4 : vector<1x8xf32> to vector<8x8xf32>
    %28 = arith.addf %26, %27 : vector<8x8xf32>
    %c0_11 = arith.constant 0 : index
    %c0_12 = arith.constant 0 : index
    %29 = vector.load %arg4[%c0_11, %c0_12] : memref<8x8xf32, #tpu.memory_space<vmem>>, vector<8x8xf32>
    tpu.vector_store %arg4[%c0_11, %c0_12], %28 {strides = array<i32>} : memref<8x8xf32, #tpu.memory_space<vmem>>, vector<8x8xf32>,
    return
  }
  func.func @transform_0(%arg0: i32) -> (i32, i32) {
    %c0_i32 = arith.constant 0 : i32
    %c0_i32_0 = arith.constant 0 : i32
    return %c0_i32, %arg0 : i32, i32
  }
  func.func @transform_1(%arg0: i32) -> (i32, i32) {
    %c0_i32 = arith.constant 0 : i32
    %c0_i32_0 = arith.constant 0 : i32
    %c0_i32_1 = arith.constant 0 : i32
    return %c0_i32, %c0_i32_0 : i32, i32
  }
  func.func @transform_2(%arg0: i32) -> (i32, i32) {
    %c0_i32 = arith.constant 0 : i32
    %c0_i32_0 = arith.constant 0 : i32
    %c0_i32_1 = arith.constant 0 : i32
    return %c0_i32, %c0_i32_0 : i32, i32
  }
  func.func @transform_3(%arg0: i32) -> (i32, i32) {
    %c0_i32 = arith.constant 0 : i32
    %c0_i32_0 = arith.constant 0 : i32
    return %c0_i32, %arg0 : i32, i32
  }
}

</mosaic_0001>

<bundles_post_ra>
// kernel: tpu_custom_call.1
= control target key start
LH: loop header
LB: loop body
LE: loop exit
PB: predicated region body
PF: predicated region fallthrough
CT: control target
= control target key end

     0   :  { %vm17_vm0 = vcmask 64512   ;;  %v198_v2 = vmov 0.0|0.0   ;;  %vm199_vm1 = vmmov 0   ;;  %v200_v5 = vmov 0.0   ;;  %s252_s0 = inlined_call_operand.vmem [shape: f32[16,8], index: 0, kind: input, shape index: {}]   ;;  %s253_s1 = inlined_call_operand.vmem [shape: f32[8,16], index: 1, kind: input, shape index: {}]   ;;  %s254_s2 = inlined_call_operand.vmem [shape: f32[8,1], index: 2, kind: input, shape index: {}]   ;;  %s255_s3 = inlined_call_operand.hbm [shape: f32[8,8], index: 3, kind: output, shape index: {}]  }
   0x1   :  { %v15_v0 = vld [vmem:[%s252_s0] sm:$0xff]  ;;  %v16_v1 = vld [vmem:[%s252_s0 + $0x8] sm:$0xff]  ;;  %163 = vmatprep.subr.bf16.mxu0 %v198_v2  ;;  %160 = vmatprep.mubr.msk.f32.mxu0 %vm199_vm1, %v200_v5  ;;  %v201_v8 = vmov 0  }
   0x2   :  { %v18_v3 = vsel %vm17_vm0, %v15_v0, 0.0  ;;  %v19_v4 = vsel %vm17_vm0, %v16_v1, 0.0  ;;  %v48_v6 = vld [vmem:[%s254_s2] sm:$0xff]  ;;  %171 = vset.pattern.permute.xlu0 %v201_v8 }
   0x3   :  { %v20_v7 = vadd.f32 %v19_v4, %v18_v3 }
   0x4   :  { %8 = vsyncpa [#allocation3], 0  ;;  %51 = vperm.xlu0 %171, %v48_v6   ;;  %v47_v35 = vld [vmem:[%s253_s1] sm:$0xff]  ;;  %vm54_vm2 = vcmask 130048   ;;  %s202_s18 = smov [#allocation2]  }
   0x5   :  { %v21_v9 = vrot.slane %v20_v7, 4  ;;  %s144_s19 = sshll.u32 %s202_s18, 4  ;;  %s145_s19 = int_to_ptr.vmem [resolvable:$true] %s144_s19 }
   0x6   :  { %s174_s1 = scalar_lea.vmem %s145_s19, 128  ;;  %p179_p1 = scmp.lt.s32.totalorder %s145_s19, %s145_s19 }
   0x7   :  { %v22_v10 = vadd.f32 %v21_v9, %v20_v7  ;;  %p175_p0 = scmp.ne.s32.totalorder %s145_s19, %s174_s1  ;;  %p180_p2 = scmp.lt.s32.totalorder %s174_s1, %s174_s1 }
   0x9   :  { %v23_v11 = vrot.slane %v22_v10, 2  ;;  %p181_p3 = por %p180_p2, %p179_p1 }
   0xb   :  { %v24_v12 = vadd.f32 %v23_v11, %v22_v10  ;;  %p182_p4 = pnand %p181_p3, %p175_p0 }
   0xd   :  { %v25_v13 = vrot.slane %v24_v12, 1 }
   0xf   :  { %v26_v14 = vadd.f32 %v25_v13, %v24_v12 }
  0x11   :  { %v28_v15 = vmul.f32 0.0625, %v26_v14 }
  0x13   :  { %v29_v16 = vsub.f32 %v15_v0, %v28_v15  ;;  %v30_v17 = vsub.f32 %v16_v1, %v28_v15 }
  0x15   :  { %v31_v18 = vmul.f32 %v29_v16, %v29_v16  ;;  %v32_v19 = vmul.f32 %v30_v17, %v30_v17 }
  0x17   :  { %v33_v20 = vsel %vm17_vm0, %v31_v18, 0.0  ;;  %v34_v21 = vsel %vm17_vm0, %v32_v19, 0.0 }
  0x18   :  { %v35_v22 = vadd.f32 %v34_v21, %v33_v20 }
  0x1a   :  { %v36_v23 = vrot.slane %v35_v22, 4 }
  0x1c   :  { %v37_v24 = vadd.f32 %v36_v23, %v35_v22 }
  0x1e   :  { %v38_v25 = vrot.slane %v37_v24, 2 }
  0x20   :  { %v39_v26 = vadd.f32 %v38_v25, %v37_v24 }
  0x22   :  { %v40_v27 = vrot.slane %v39_v26, 1 }
  0x24   :  { %v41_v28 = vadd.f32 %v40_v27, %v39_v26 }
  0x26   :  { %v42_v29 = vmul.f32 0.0625, %v41_v28 }
  0x28   :  { %v43_v30 = vadd.f32 1e-05, %v42_v29 }
  0x2a   :  { %172 = vrsqrt.f32 %v43_v30  ;;  %vm130_vm3 = vcmp.eq.f32.partialorder %v43_v30, inf  ;;  %v133_v37 = vand.u32 2147483648, %v43_v30  ;;  %vm132_vm4 = vcmp.eq.f32.partialorder %v43_v30, 0.0 }
  0x34   :  { %v173_v31 = vpop.eup %172 }
  0x35   :  { %v45_v32 = vmul.f32 %v173_v31, %v29_v16  ;;  %v46_v33 = vmul.f32 %v173_v31, %v30_v17  ;;  %v129_v36 = vmul.f32 %v173_v31, %v43_v30 }
  0x37   :  { %v164_v34 = vpack.c.bf16 %v46_v33, %v45_v32  ;;  %v131_v38 = vsel %vm130_vm3, %v43_v30, %v129_v36 }
  0x38   :  { %v134_v41 = vsel %vm132_vm4, %v133_v37, %v131_v38 }
  0x39   :  { %165 = vmatpush3.bf16.msra.mxu0 %v164_v34 }
  0x3c   :  { %161 = vmatmul.mubr.msk.f32.vlgmr.msra.gmra.mrb[0].mxu0 %vm54_vm2, %v47_v35 }
  0x83   :  { %v52_v39 = vpop.permute.xlu0 %51 }
 0x10f   :  { %v124_v40 = vpop.f32.mrb[0].mxu0 }
 0x110   :  { %v125_v42 = vadd.f32 %v124_v40, %v52_v39  ;;  %v162_v43 = vpop.f32.mrb[1].mxu0 }
 0x112   :  { %v135_v44 = vmul.f32 %v134_v41, %v125_v42 }
 0x114   :  { %v136_v45 = vadd.f32 %v135_v44, %v28_v15 }
 0x116   :  { %137 = vst.msk [vmem:[#allocation2] sm:$0xff] %vm17_vm0, %v136_v45 }
 0x117   :  { %185 = shalt.err (!%p182_p4)
}
 0x118   :  { %s186_s22 = scalar_lea.hbm %s255_s3, 128 }
 0x119   :  { %p187_p5 = scmp.ne.s32.totalorder %s255_s3, %s186_s22  ;;  %p190_p6 = scmp.lt.u32.totalorder %s186_s22, %s255_s3 }
 0x11b   :  { %p192_p7 = pnand %p190_p6, %p187_p5 }
 0x11d   :  { %195 = shalt.err (!%p192_p7)
}
 0x11e   :  { %147 = dma.vmem_to_hbm [thread:$0]  %s145_s19, 128, %s255_s3, [#allocation3]  }
 0x11f   :  { %196 = dma.done.wait [#allocation3], 128  }
 0x120   :  { %197 = vsyncadd [#allocation3], 4294967168 }
 0x121   :  { %151 = vsyncpa [#allocation3], 1 }

</bundles_post_ra>
